<compile_context>
chip_gen: v5e
topology: v5e:2x2
jax: 0.10.0
libtpu: 0.0.40
codegen_flags: <defaults>
</compile_context>

<pallas_src>
import jax
import jax.numpy as jnp
from jax.experimental import pallas as pl
from jax.experimental.pallas import tpu as pltpu


def _sigmoid_one_push(z):
    # sigmoid(z) == 0.5 * (tanh(z/2) + 1): a single EUP transcendental.
    return jnp.tanh(0.5 * z) * 0.5 + 0.5


def generator_kernel(w1_ref, b1_ref, w2_ref, b2_ref, x_ref, o_ref):
    """Tiny MLP forward, batch packed onto full (8, LB) tiles.

    w1_ref: (3,)  SMEM  -- Linear(1, 3) weight (squeezed from (3, 1))
    b1_ref: (3,)  SMEM
    w2_ref: (12,) SMEM  -- Linear(3, 4) weight as (in, out) = W2.T, flattened
                           row-major: element (i, j) at index 4*i + j
    b2_ref: (4,)  SMEM
    x_ref : (8, LB)    VMEM -- batch folded on sublanes x lanes
    o_ref : (4, 8, LB) VMEM -- one full (8, LB) slab per output feature
    """
    x = x_ref[...]  # (8, LB) f32

    # Layer 1: Linear(1, 3) + Sigmoid -> 3 scalar*vector FMAs + 3 EUP pushes.
    h1 = [_sigmoid_one_push(w1_ref[k] * x + b1_ref[k]) for k in range(3)]

    # Layer 2: Linear(3, 4) + Sigmoid -> 3 FMAs + 1 EUP push per feature,
    # each stored directly into its own (8, LB) output slab.
    for j in range(4):
        z = (h1[0] * w2_ref[0 * 4 + j]
             + h1[1] * w2_ref[1 * 4 + j]
             + h1[2] * w2_ref[2 * 4 + j]
             + b2_ref[j])
        o_ref[j, :, :] = _sigmoid_one_push(z).astype(o_ref.dtype)


def _generator_ref(xf, w1, b1, w2, b2):
    """Plain-JAX reference / small-batch fast path. xf: (B,) f32 -> (B, 4)."""
    h = jax.nn.sigmoid(xf[:, None] * w1[None, :] + b1[None, :])
    return jax.nn.sigmoid(h @ w2 + b2[None, :])


def generator_forward(x, w1, b1, w2, b2, *, lane_block=32768,
                      min_kernel_batch=4096, force_kernel=False,
                      out_dtype=jnp.float32):
    """Forward of Generator: sigmoid(sigmoid(x @ W1.T + b1) @ W2.T + b2).

    x : (B, 1) f32
    w1: (3,)   f32   (PyTorch W1 (3,1) squeezed)
    b1: (3,)   f32
    w2: (3, 4) f32   (PyTorch W2 (4,3) transposed to (in, out))
    b2: (4,)   f32
    Returns (B, 4).

    out_dtype: on bandwidth-bound chips (v5e) jnp.bfloat16 roughly halves
    output-side HBM traffic; default f32 to match the PyTorch module.
    """
    B = x.shape[0]
    xf = x[:, 0].astype(jnp.float32)

    # Fast path: at small B the kernel launch + pad/reshape glue dominates.
    if B < min_kernel_batch and not force_kernel:
        return _generator_ref(xf, w1, b1, w2, b2).astype(out_dtype)

    # ---- Pallas path: fold batch onto 8 sublanes x ncols lanes. ----
    lane_block = max(128, (lane_block // 128) * 128)       # multiple of 128
    ncols = ((pl.cdiv(B, 8) + 127) // 128) * 128           # lanes, mult of 128
    lb = min(lane_block, ncols)                            # still mult of 128
    ncols_p = ((ncols + lb - 1) // lb) * lb                # mult of lb
    bp = 8 * ncols_p                                       # padded batch

    # Zero-pad and fold; padded slots hold harmless sigmoid(bias) garbage that
    # is sliced off below.
    xp = jnp.zeros((bp,), jnp.float32).at[:B].set(xf).reshape(8, ncols_p)

    smem = pl.BlockSpec(memory_space=pltpu.MemorySpace.SMEM)
    out_fm = pl.pallas_call(
        generator_kernel,
        out_shape=jax.ShapeDtypeStruct((4, 8, ncols_p), out_dtype),
        grid=(ncols_p // lb,),
        in_specs=[smem, smem, smem, smem,
                  pl.BlockSpec((8, lb), lambda i: (0, i))],
        out_specs=pl.BlockSpec((4, 8, lb), lambda i: (0, 0, i)),
        compiler_params=pltpu.CompilerParams(
            dimension_semantics=("parallel",)),
    )(w1, b1, w2.reshape(12), b2, xp)

    # Un-fold back to (B, 4).  (For very large B, callers that can consume the
    # feature-major (4, 8, ncols_p) layout directly avoid this extra HBM pass.)
    return out_fm.transpose(1, 2, 0).reshape(bp, 4)[:B]


def init_params(key):
    """PyTorch-style uniform(-1/sqrt(fan_in), 1/sqrt(fan_in)) init.

    Layouts chosen for the kernel:
      w1: (3,)  -- Linear(1,3).weight squeezed
      b1: (3,)
      w2: (3,4) -- Linear(3,4).weight transposed to (in, out)
      b2: (4,)
    """
    k1, k2, k3, k4 = jax.random.split(key, 4)
    bound1 = 1.0  # fan_in = 1
    w1 = jax.random.uniform(k1, (3,), jnp.float32, -bound1, bound1)
    b1 = jax.random.uniform(k2, (3,), jnp.float32, -bound1, bound1)
    bound2 = 1.0 / jnp.sqrt(3.0)  # fan_in = 3
    w2 = jax.random.uniform(k3, (3, 4), jnp.float32, -bound2, bound2)
    b2 = jax.random.uniform(k4, (4,), jnp.float32, -bound2, bound2)
    return w1, b1, w2, b2


# TODO(synk): the PyTorch `train` method (SGD step / loss backward against a
# discriminator, counter/progress bookkeeping) is training glue, not part of
# the forward pass; only forward is implemented as a Pallas kernel.

if __name__ == "__main__":
    key = jax.random.PRNGKey(0)
    k_params, k_in1, k_in2 = jax.random.split(key, 3)
    w1, b1, w2, b2 = init_params(k_params)

    # --- Small demo batch (matches nn.Linear(1, 3) input features). ---
    B = 8
    x = jax.random.normal(k_in1, (B, 1), jnp.float32)
    ref = _generator_ref(x[:, 0], w1, b1, w2, b2)

    # Fast path (what generator_forward does by default at tiny B).
    out_fast = jax.block_until_ready(generator_forward(x, w1, b1, w2, b2))
    assert out_fast.shape == (B, 4)
    assert jnp.allclose(out_fast, ref, atol=1e-5), "fast-path mismatch"

    # Force the Pallas kernel on the same small batch.
    out_kern = jax.block_until_ready(
        generator_forward(x, w1, b1, w2, b2, force_kernel=True))
    assert out_kern.shape == (B, 4)
    assert jnp.allclose(out_kern, ref, atol=1e-5), "kernel mismatch (B=8)"

    # Exercise padding + a multi-step "parallel" grid with a small lane block.
    B2 = 2048
    x2 = jax.random.normal(k_in2, (B2, 1), jnp.float32)
    ref2 = _generator_ref(x2[:, 0], w1, b1, w2, b2)
    out2 = jax.block_until_ready(
        generator_forward(x2, w1, b1, w2, b2, lane_block=128,
                          force_kernel=True))
    assert out2.shape == (B2, 4)
    assert jnp.allclose(out2, ref2, atol=1e-5), "kernel mismatch (B=2048)"

    print("KERNEL_OK")
</pallas_src>

<mosaic_0001>
module attributes {stable_mosaic.version = 11 : i64} {
  func.func @generator_kernel(%arg0: i32, %arg1: memref<3xf32, #tpu.memory_space<smem>>, %arg2: memref<3xf32, #tpu.memory_space<smem>>, %arg3: memref<12xf32, #tpu.memory_space<smem>>, %arg4: memref<4xf32, #tpu.memory_space<smem>>, %arg5: memref<8x128xf32, #tpu.memory_space<vmem>>, %arg6: memref<4x8x128xf32, #tpu.memory_space<vmem>>) attributes {dimension_semantics = [#tpu.dimension_semantics<parallel>], iteration_bounds = array<i64: 1>, scalar_prefetch = 0 : i64, scratch_operands = 0 : i64, tpu.core_type = #tpu.core_type<tc>, window_params = [{transform_indices = @transform_0, window_bounds = array<i64: 3>}, {transform_indices = @transform_1, window_bounds = array<i64: 3>}, {transform_indices = @transform_2, window_bounds = array<i64: 12>}, {transform_indices = @transform_3, window_bounds = array<i64: 4>}, {transform_indices = @transform_4, window_bounds = array<i64: 8, 128>}, {transform_indices = @transform_5, window_bounds = array<i64: 4, 8, 128>}]} {
    %c0 = arith.constant 0 : index
    %c0_0 = arith.constant 0 : index
    %0 = vector.load %arg5[%c0, %c0_0] : memref<8x128xf32, #tpu.memory_space<vmem>>, vector<8x128xf32>
    %c0_1 = arith.constant 0 : index
    %1 = memref.load %arg1[%c0_1] : memref<3xf32, #tpu.memory_space<smem>>
    %2 = vector.broadcast %1 : f32 to vector<8x128xf32>
    %3 = arith.mulf %2, %0 : vector<8x128xf32>
    %c0_2 = arith.constant 0 : index
    %4 = memref.load %arg2[%c0_2] : memref<3xf32, #tpu.memory_space<smem>>
    %5 = vector.broadcast %4 : f32 to vector<8x128xf32>
    %6 = arith.addf %3, %5 : vector<8x128xf32>
    %cst = arith.constant 5.000000e-01 : f32
    %7 = vector.broadcast %cst : f32 to vector<8x128xf32>
    %8 = arith.mulf %7, %6 : vector<8x128xf32>
    %9 = math.tanh %8 : vector<8x128xf32>
    %cst_3 = arith.constant 5.000000e-01 : f32
    %10 = vector.broadcast %cst_3 : f32 to vector<8x128xf32>
    %11 = arith.mulf %9, %10 : vector<8x128xf32>
    %cst_4 = arith.constant 5.000000e-01 : f32
    %12 = vector.broadcast %cst_4 : f32 to vector<8x128xf32>
    %13 = arith.addf %11, %12 : vector<8x128xf32>
    %c1 = arith.constant 1 : index
    %14 = memref.load %arg1[%c1] : memref<3xf32, #tpu.memory_space<smem>>
    %15 = vector.broadcast %14 : f32 to vector<8x128xf32>
    %16 = arith.mulf %15, %0 : vector<8x128xf32>
    %c1_5 = arith.constant 1 : index
    %17 = memref.load %arg2[%c1_5] : memref<3xf32, #tpu.memory_space<smem>>
    %18 = vector.broadcast %17 : f32 to vector<8x128xf32>
    %19 = arith.addf %16, %18 : vector<8x128xf32>
    %cst_6 = arith.constant 5.000000e-01 : f32
    %20 = vector.broadcast %cst_6 : f32 to vector<8x128xf32>
    %21 = arith.mulf %20, %19 : vector<8x128xf32>
    %22 = math.tanh %21 : vector<8x128xf32>
    %cst_7 = arith.constant 5.000000e-01 : f32
    %23 = vector.broadcast %cst_7 : f32 to vector<8x128xf32>
    %24 = arith.mulf %22, %23 : vector<8x128xf32>
    %cst_8 = arith.constant 5.000000e-01 : f32
    %25 = vector.broadcast %cst_8 : f32 to vector<8x128xf32>
    %26 = arith.addf %24, %25 : vector<8x128xf32>
    %c2 = arith.constant 2 : index
    %27 = memref.load %arg1[%c2] : memref<3xf32, #tpu.memory_space<smem>>
    %28 = vector.broadcast %27 : f32 to vector<8x128xf32>
    %29 = arith.mulf %28, %0 : vector<8x128xf32>
    %c2_9 = arith.constant 2 : index
    %30 = memref.load %arg2[%c2_9] : memref<3xf32, #tpu.memory_space<smem>>
    %31 = vector.broadcast %30 : f32 to vector<8x128xf32>
    %32 = arith.addf %29, %31 : vector<8x128xf32>
    %cst_10 = arith.constant 5.000000e-01 : f32
    %33 = vector.broadcast %cst_10 : f32 to vector<8x128xf32>
    %34 = arith.mulf %33, %32 : vector<8x128xf32>
    %35 = math.tanh %34 : vector<8x128xf32>
    %cst_11 = arith.constant 5.000000e-01 : f32
    %36 = vector.broadcast %cst_11 : f32 to vector<8x128xf32>
    %37 = arith.mulf %35, %36 : vector<8x128xf32>
    %cst_12 = arith.constant 5.000000e-01 : f32
    %38 = vector.broadcast %cst_12 : f32 to vector<8x128xf32>
    %39 = arith.addf %37, %38 : vector<8x128xf32>
    %c0_13 = arith.constant 0 : index
    %40 = memref.load %arg3[%c0_13] : memref<12xf32, #tpu.memory_space<smem>>
    %41 = vector.broadcast %40 : f32 to vector<8x128xf32>
    %42 = arith.mulf %13, %41 : vector<8x128xf32>
    %c4 = arith.constant 4 : index
    %43 = memref.load %arg3[%c4] : memref<12xf32, #tpu.memory_space<smem>>
    %44 = vector.broadcast %43 : f32 to vector<8x128xf32>
    %45 = arith.mulf %26, %44 : vector<8x128xf32>
    %46 = arith.addf %42, %45 : vector<8x128xf32>
    %c8 = arith.constant 8 : index
    %47 = memref.load %arg3[%c8] : memref<12xf32, #tpu.memory_space<smem>>
    %48 = vector.broadcast %47 : f32 to vector<8x128xf32>
    %49 = arith.mulf %39, %48 : vector<8x128xf32>
    %50 = arith.addf %46, %49 : vector<8x128xf32>
    %c0_14 = arith.constant 0 : index
    %51 = memref.load %arg4[%c0_14] : memref<4xf32, #tpu.memory_space<smem>>
    %52 = vector.broadcast %51 : f32 to vector<8x128xf32>
    %53 = arith.addf %50, %52 : vector<8x128xf32>
    %cst_15 = arith.constant 5.000000e-01 : f32
    %54 = vector.broadcast %cst_15 : f32 to vector<8x128xf32>
    %55 = arith.mulf %54, %53 : vector<8x128xf32>
    %56 = math.tanh %55 : vector<8x128xf32>
    %cst_16 = arith.constant 5.000000e-01 : f32
    %57 = vector.broadcast %cst_16 : f32 to vector<8x128xf32>
    %58 = arith.mulf %56, %57 : vector<8x128xf32>
    %cst_17 = arith.constant 5.000000e-01 : f32
    %59 = vector.broadcast %cst_17 : f32 to vector<8x128xf32>
    %60 = arith.addf %58, %59 : vector<8x128xf32>
    %c0_18 = arith.constant 0 : index
    %c0_19 = arith.constant 0 : index
    %c0_20 = arith.constant 0 : index
    %61 = vector.load %arg6[%c0_18, %c0_19, %c0_20] : memref<4x8x128xf32, #tpu.memory_space<vmem>>, vector<1x8x128xf32>
    %62 = vector.shape_cast %61 : vector<1x8x128xf32> to vector<8x128xf32>
    %63 = vector.shape_cast %60 : vector<8x128xf32> to vector<1x8x128xf32>
    tpu.vector_store %arg6[%c0_18, %c0_19, %c0_20], %63 {strides = array<i32>} : memref<4x8x128xf32, #tpu.memory_space<vmem>>, vector<1x8x128xf32>,
    %c1_21 = arith.constant 1 : index
    %64 = memref.load %arg3[%c1_21] : memref<12xf32, #tpu.memory_space<smem>>
    %65 = vector.broadcast %64 : f32 to vector<8x128xf32>
    %66 = arith.mulf %13, %65 : vector<8x128xf32>
    %c5 = arith.constant 5 : index
    %67 = memref.load %arg3[%c5] : memref<12xf32, #tpu.memory_space<smem>>
    %68 = vector.broadcast %67 : f32 to vector<8x128xf32>
    %69 = arith.mulf %26, %68 : vector<8x128xf32>
    %70 = arith.addf %66, %69 : vector<8x128xf32>
    %c9 = arith.constant 9 : index
    %71 = memref.load %arg3[%c9] : memref<12xf32, #tpu.memory_space<smem>>
    %72 = vector.broadcast %71 : f32 to vector<8x128xf32>
    %73 = arith.mulf %39, %72 : vector<8x128xf32>
    %74 = arith.addf %70, %73 : vector<8x128xf32>
    %c1_22 = arith.constant 1 : index
    %75 = memref.load %arg4[%c1_22] : memref<4xf32, #tpu.memory_space<smem>>
    %76 = vector.broadcast %75 : f32 to vector<8x128xf32>
    %77 = arith.addf %74, %76 : vector<8x128xf32>
    %cst_23 = arith.constant 5.000000e-01 : f32
    %78 = vector.broadcast %cst_23 : f32 to vector<8x128xf32>
    %79 = arith.mulf %78, %77 : vector<8x128xf32>
    %80 = math.tanh %79 : vector<8x128xf32>
    %cst_24 = arith.constant 5.000000e-01 : f32
    %81 = vector.broadcast %cst_24 : f32 to vector<8x128xf32>
    %82 = arith.mulf %80, %81 : vector<8x128xf32>
    %cst_25 = arith.constant 5.000000e-01 : f32
    %83 = vector.broadcast %cst_25 : f32 to vector<8x128xf32>
    %84 = arith.addf %82, %83 : vector<8x128xf32>
    %c1_26 = arith.constant 1 : index
    %c0_27 = arith.constant 0 : index
    %c0_28 = arith.constant 0 : index
    %85 = vector.load %arg6[%c1_26, %c0_27, %c0_28] : memref<4x8x128xf32, #tpu.memory_space<vmem>>, vector<1x8x128xf32>
    %86 = vector.shape_cast %85 : vector<1x8x128xf32> to vector<8x128xf32>
    %87 = vector.shape_cast %84 : vector<8x128xf32> to vector<1x8x128xf32>
    tpu.vector_store %arg6[%c1_26, %c0_27, %c0_28], %87 {strides = array<i32>} : memref<4x8x128xf32, #tpu.memory_space<vmem>>, vector<1x8x128xf32>,
    %c2_29 = arith.constant 2 : index
    %88 = memref.load %arg3[%c2_29] : memref<12xf32, #tpu.memory_space<smem>>
    %89 = vector.broadcast %88 : f32 to vector<8x128xf32>
    %90 = arith.mulf %13, %89 : vector<8x128xf32>
    %c6 = arith.constant 6 : index
    %91 = memref.load %arg3[%c6] : memref<12xf32, #tpu.memory_space<smem>>
    %92 = vector.broadcast %91 : f32 to vector<8x128xf32>
    %93 = arith.mulf %26, %92 : vector<8x128xf32>
    %94 = arith.addf %90, %93 : vector<8x128xf32>
    %c10 = arith.constant 10 : index
    %95 = memref.load %arg3[%c10] : memref<12xf32, #tpu.memory_space<smem>>
    %96 = vector.broadcast %95 : f32 to vector<8x128xf32>
    %97 = arith.mulf %39, %96 : vector<8x128xf32>
    %98 = arith.addf %94, %97 : vector<8x128xf32>
    %c2_30 = arith.constant 2 : index
    %99 = memref.load %arg4[%c2_30] : memref<4xf32, #tpu.memory_space<smem>>
    %100 = vector.broadcast %99 : f32 to vector<8x128xf32>
    %101 = arith.addf %98, %100 : vector<8x128xf32>
    %cst_31 = arith.constant 5.000000e-01 : f32
    %102 = vector.broadcast %cst_31 : f32 to vector<8x128xf32>
    %103 = arith.mulf %102, %101 : vector<8x128xf32>
    %104 = math.tanh %103 : vector<8x128xf32>
    %cst_32 = arith.constant 5.000000e-01 : f32
    %105 = vector.broadcast %cst_32 : f32 to vector<8x128xf32>
    %106 = arith.mulf %104, %105 : vector<8x128xf32>
    %cst_33 = arith.constant 5.000000e-01 : f32
    %107 = vector.broadcast %cst_33 : f32 to vector<8x128xf32>
    %108 = arith.addf %106, %107 : vector<8x128xf32>
    %c2_34 = arith.constant 2 : index
    %c0_35 = arith.constant 0 : index
    %c0_36 = arith.constant 0 : index
    %109 = vector.load %arg6[%c2_34, %c0_35, %c0_36] : memref<4x8x128xf32, #tpu.memory_space<vmem>>, vector<1x8x128xf32>
    %110 = vector.shape_cast %109 : vector<1x8x128xf32> to vector<8x128xf32>
    %111 = vector.shape_cast %108 : vector<8x128xf32> to vector<1x8x128xf32>
    tpu.vector_store %arg6[%c2_34, %c0_35, %c0_36], %111 {strides = array<i32>} : memref<4x8x128xf32, #tpu.memory_space<vmem>>, vector<1x8x128xf32>,
    %c3 = arith.constant 3 : index
    %112 = memref.load %arg3[%c3] : memref<12xf32, #tpu.memory_space<smem>>
    %113 = vector.broadcast %112 : f32 to vector<8x128xf32>
    %114 = arith.mulf %13, %113 : vector<8x128xf32>
    %c7 = arith.constant 7 : index
    %115 = memref.load %arg3[%c7] : memref<12xf32, #tpu.memory_space<smem>>
    %116 = vector.broadcast %115 : f32 to vector<8x128xf32>
    %117 = arith.mulf %26, %116 : vector<8x128xf32>
    %118 = arith.addf %114, %117 : vector<8x128xf32>
    %c11 = arith.constant 11 : index
    %119 = memref.load %arg3[%c11] : memref<12xf32, #tpu.memory_space<smem>>
    %120 = vector.broadcast %119 : f32 to vector<8x128xf32>
    %121 = arith.mulf %39, %120 : vector<8x128xf32>
    %122 = arith.addf %118, %121 : vector<8x128xf32>
    %c3_37 = arith.constant 3 : index
    %123 = memref.load %arg4[%c3_37] : memref<4xf32, #tpu.memory_space<smem>>
    %124 = vector.broadcast %123 : f32 to vector<8x128xf32>
    %125 = arith.addf %122, %124 : vector<8x128xf32>
    %cst_38 = arith.constant 5.000000e-01 : f32
    %126 = vector.broadcast %cst_38 : f32 to vector<8x128xf32>
    %127 = arith.mulf %126, %125 : vector<8x128xf32>
    %128 = math.tanh %127 : vector<8x128xf32>
    %cst_39 = arith.constant 5.000000e-01 : f32
    %129 = vector.broadcast %cst_39 : f32 to vector<8x128xf32>
    %130 = arith.mulf %128, %129 : vector<8x128xf32>
    %cst_40 = arith.constant 5.000000e-01 : f32
    %131 = vector.broadcast %cst_40 : f32 to vector<8x128xf32>
    %132 = arith.addf %130, %131 : vector<8x128xf32>
    %c3_41 = arith.constant 3 : index
    %c0_42 = arith.constant 0 : index
    %c0_43 = arith.constant 0 : index
    %133 = vector.load %arg6[%c3_41, %c0_42, %c0_43] : memref<4x8x128xf32, #tpu.memory_space<vmem>>, vector<1x8x128xf32>
    %134 = vector.shape_cast %133 : vector<1x8x128xf32> to vector<8x128xf32>
    %135 = vector.shape_cast %132 : vector<8x128xf32> to vector<1x8x128xf32>
    tpu.vector_store %arg6[%c3_41, %c0_42, %c0_43], %135 {strides = array<i32>} : memref<4x8x128xf32, #tpu.memory_space<vmem>>, vector<1x8x128xf32>,
    return
  }
  func.func @transform_0(%arg0: i32) -> i32 {
    %c0_i32 = arith.constant 0 : i32
    %c0_i32_0 = arith.constant 0 : i32
    return %c0_i32 : i32
  }
  func.func @transform_1(%arg0: i32) -> i32 {
    %c0_i32 = arith.constant 0 : i32
    %c0_i32_0 = arith.constant 0 : i32
    return %c0_i32 : i32
  }
  func.func @transform_2(%arg0: i32) -> i32 {
    %c0_i32 = arith.constant 0 : i32
    %c0_i32_0 = arith.constant 0 : i32
    return %c0_i32 : i32
  }
  func.func @transform_3(%arg0: i32) -> i32 {
    %c0_i32 = arith.constant 0 : i32
    %c0_i32_0 = arith.constant 0 : i32
    return %c0_i32 : i32
  }
  func.func @transform_4(%arg0: i32) -> (i32, i32) {
    %c0_i32 = arith.constant 0 : i32
    %c0_i32_0 = arith.constant 0 : i32
    return %c0_i32, %arg0 : i32, i32
  }
  func.func @transform_5(%arg0: i32) -> (i32, i32, i32) {
    %c0_i32 = arith.constant 0 : i32
    %c0_i32_0 = arith.constant 0 : i32
    %c0_i32_1 = arith.constant 0 : i32
    return %c0_i32, %c0_i32_0, %arg0 : i32, i32, i32
  }
}

</mosaic_0001>

<bundles_post_ra>
// kernel: tpu_custom_call.1
= control target key start
LH: loop header
LB: loop body
LE: loop exit
PB: predicated region body
PF: predicated region fallthrough
CT: control target
= control target key end

     0   :  { %10 = vsyncpa [#allocation5], 0  ;;  %s469_s0 = inlined_call_operand.hbm [shape: f32[3], index: 0, kind: input, shape index: {}]   ;;  %s470_s1 = inlined_call_operand.hbm [shape: f32[3], index: 1, kind: input, shape index: {}]   ;;  %s471_s2 = inlined_call_operand.vmem [shape: f32[12], index: 2, kind: input, shape index: {}]   ;;  %s472_s3 = inlined_call_operand.vmem [shape: f32[4], index: 3, kind: input, shape index: {}]   ;;  %s473_s4 = inlined_call_operand.hbm [shape: f32[8,128], index: 4, kind: input, shape index: {}]   ;;  %s474_s5 = inlined_call_operand.hbm [shape: f32[4,8,128], index: 5, kind: output, shape index: {}]  }
   0x1   :  { %11 = vsyncpa [#allocation8], 0 }
   0x2   :  { %12 = vsyncpa [#allocation6], 0 }
   0x3   :  { %13 = vsyncpa [#allocation11], 0 }
   0x4   :  { %14 = vsyncpa [#allocation3], 0 }
   0x5   :  { %15 = vsyncpa [#allocation4], 0  ;;  %s21_s20 = sshll.u32 %s469_s0, 4  ;;  %s30_s23 = sshll.u32 %s470_s1, 4  ;;  %s22_s20 = int_to_ptr.hbm [resolvable:$true] %s21_s20  ;;  %s31_s23 = int_to_ptr.hbm [resolvable:$true] %s30_s23 }
   0x6   :  { %s365_s24 = smov [#allocation2]   ;;  %s366_s25 = smov [#allocation7]  }
   0x7   :  { %24 = dma.hbm_to_smem %s22_s20, 16, %s365_s24, [#allocation5]  }
   0x8   :  { %33 = dma.hbm_to_smem %s31_s23, 16, %s366_s25, [#allocation8]  }
   0x9   :  { %s39_s28 = sshll.u32 %s471_s2, 4  ;;  %s48_s6 = sshll.u32 %s472_s3, 4  ;;  %s40_s28 = int_to_ptr.vmem [resolvable:$true] %s39_s28  ;;  %s49_s6 = int_to_ptr.vmem [resolvable:$true] %s48_s6 }
   0xa   :  { %s367_s0 = smov [#allocation9]   ;;  %s368_s7 = smov [#allocation10]  }
   0xb   :  { %42 = dma.vmem_to_smem %s40_s28, 16, %s367_s0, [#allocation6]  }
   0xc   :  { %51 = dma.vmem_to_smem %s49_s6, 16, %s368_s7, [#allocation11]  }
   0xd   :  { %s57_s9 = sshll.u32 %s473_s4, 4  ;;  %s369_s10 = smov [#allocation12]   ;;  %s58_s9 = int_to_ptr.hbm [resolvable:$true] %s57_s9 }
   0xe   :  { %s59_s11 = sshll.u32 %s369_s10, 4  ;;  %s60_s11 = int_to_ptr.vmem [resolvable:$true] %s59_s11 }
   0xf   :  { %62 = dma.hbm_to_vmem [thread:$0]  %s58_s9, 128, %s60_s11, [#allocation3]  }
  0x10   :  { %353 = dma.done.wait [#allocation5], 16  }
  0x11   :  { %354 = vsyncadd [#allocation5], 4294967280 }
  0x12   :  { %355 = dma.done.wait [#allocation8], 16  }
  0x13   :  { %356 = vsyncadd [#allocation8], 4294967280 }
  0x14   :  { %357 = dma.done.wait [#allocation6], 16  }
  0x15   :  { %358 = vsyncadd [#allocation6], 4294967280 }
  0x16   :  { %359 = dma.done.wait [#allocation11], 16  }
  0x17   :  { %360 = vsyncadd [#allocation11], 4294967280 }
  0x18   :  { %361 = dma.done.wait [#allocation3], 128  }
  0x19   :  { %362 = vsyncadd [#allocation3], 4294967168 }
  0x1a   :  { %83 = sfence }
  0x1b   :  { %s85_s2 = sld [smem:[#allocation2]]  ;;  %v84_v0 = vld [vmem:[#allocation12] sm:$0xff]  ;;  %s370_s6 = smov [#allocation13]  }
  0x1c   :  { %s88_s3 = sld [smem:[#allocation7]]  ;;  %s198_s0 = sshll.u32 %s370_s6, 4  ;;  %s199_s0 = int_to_ptr.vmem [resolvable:$true] %s198_s0 }
  0x1d   :  { %s217_s12 = sld [smem:[#allocation2 + $0x1]]  ;;  %s200_s8 = sshll.u32 %s474_s5, 4  ;;  %s201_s8 = int_to_ptr.hbm [resolvable:$true] %s200_s8 }
  0x1e   :  { %s218_s4 = sld [smem:[#allocation7 + $0x1]]  ;;  %s371_s9 = smov 128  }
  0x1f   :  { %s219_s13 = sld [smem:[#allocation2 + $0x2]]  ;;  %s372_s10 = smov 8  }
  0x20   :  { %s220_s14 = sld [smem:[#allocation7 + $0x2]] }
  0x21   :  { %v86_v1 = vstv %s85_s2  ;;  %s418_s15 = sld [smem:[#allocation9]] }
  0x22   :  { %v87_v2 = vmul.f32 %v86_v1, %v84_v0  ;;  %v89_v3 = vstv %s88_s3  ;;  %s420_s16 = sld [smem:[#allocation9 + $0x4]] }
  0x23   :  { %v96_v4 = vstv %s217_s12  ;;  %s422_s17 = sld [smem:[#allocation9 + $0x8]] }
  0x24   :  { %v90_v5 = vadd.f32 %v89_v3, %v87_v2  ;;  %v97_v6 = vmul.f32 %v96_v4, %v84_v0  ;;  %v99_v7 = vstv %s218_s4  ;;  %s424_s18 = sld [smem:[#allocation10]] }
  0x25   :  { %v106_v8 = vstv %s219_s13  ;;  %s426_s19 = sld [smem:[#allocation9 + $0x1]] }
  0x26   :  { %v91_v9 = vmul.f32 0.5, %v90_v5  ;;  %v100_v10 = vadd.f32 %v99_v7, %v97_v6  ;;  %v107_v11 = vmul.f32 %v106_v8, %v84_v0  ;;  %v109_v12 = vstv %s220_s14  ;;  %s428_s20 = sld [smem:[#allocation9 + $0x5]] }
  0x27   :  { %s430_s21 = sld [smem:[#allocation9 + $0x9]]  ;;  %v116_v19 = vstv %s418_s15 }
  0x28   :  { %243 = vtanh.f32 %v91_v9  ;;  %v101_v13 = vmul.f32 0.5, %v100_v10  ;;  %v110_v14 = vadd.f32 %v109_v12, %v107_v11  ;;  %s432_s22 = sld [smem:[#allocation9 + $0x2]]  ;;  %v119_v20 = vstv %s420_s16 }
  0x29   :  { %s434_s23 = sld [smem:[#allocation9 + $0x6]]  ;;  %v123_v24 = vstv %s422_s17 }
  0x2a   :  { %245 = vtanh.f32 %v101_v13  ;;  %v111_v15 = vmul.f32 0.5, %v110_v14  ;;  %s436_s24 = sld [smem:[#allocation10 + $0x1]]  ;;  %v127_v27 = vstv %s424_s18 }
  0x2b   :  { %s438_s25 = sld [smem:[#allocation9 + $0xa]]  ;;  %v135_v21 = vstv %s426_s19 }
  0x2c   :  { %247 = vtanh.f32 %v111_v15  ;;  %s440_s26 = sld [smem:[#allocation9 + $0x3]]  ;;  %v138_v28 = vstv %s428_s20 }
  0x2d   :  { %s442_s27 = sld [smem:[#allocation9 + $0x7]]  ;;  %v142_v29 = vstv %s430_s21 }
  0x2e   :  { %v244_v16 = vpop.eup %243  ;;  %s444_s28 = sld [smem:[#allocation9 + $0xb]]  ;;  %v155_v25 = vstv %s432_s22 }
  0x2f   :  { %v93_v17 = vmul.f32 0.5, %v244_v16  ;;  %s449_s29 = sld [smem:[#allocation10 + $0x2]]  ;;  %v158_v30 = vstv %s434_s23 }
  0x30   :  { %v246_v18 = vpop.eup %245  ;;  %s453_s30 = sld [smem:[#allocation10 + $0x3]]  ;;  %v146_v43 = vstv %s436_s24 }
  0x31   :  { %v94_v22 = vadd.f32 0.5, %v93_v17  ;;  %v103_v23 = vmul.f32 0.5, %v246_v18  ;;  %v162_v36 = vstv %s438_s25 }
  0x32   :  { %v248_v26 = vpop.eup %247  ;;  %v175_v37 = vstv %s440_s26 }
  0x33   :  { %v104_v31 = vadd.f32 0.5, %v103_v23  ;;  %v113_v32 = vmul.f32 0.5, %v248_v26  ;;  %v117_v33 = vmul.f32 %v116_v19, %v94_v22  ;;  %v136_v34 = vmul.f32 %v135_v21, %v94_v22 }
  0x34   :  { %v156_v35 = vmul.f32 %v155_v25, %v94_v22  ;;  %v178_v38 = vstv %s442_s27  ;;  %v176_v44 = vmul.f32 %v175_v37, %v94_v22  ;;  %v182_v46 = vstv %s444_s28 }
  0x35   :  { %v114_v39 = vadd.f32 0.5, %v113_v32  ;;  %v120_v40 = vmul.f32 %v119_v20, %v104_v31  ;;  %v139_v41 = vmul.f32 %v138_v28, %v104_v31  ;;  %v159_v42 = vmul.f32 %v158_v30, %v104_v31 }
  0x36   :  { %v179_v45 = vmul.f32 %v178_v38, %v104_v31  ;;  %v166_v57 = vstv %s449_s29  ;;  %v186_v58 = vstv %s453_s30 }
  0x37   :  { %v121_v47 = vadd.f32 %v120_v40, %v117_v33  ;;  %v124_v48 = vmul.f32 %v123_v24, %v114_v39  ;;  %v140_v49 = vadd.f32 %v139_v41, %v136_v34  ;;  %v143_v50 = vmul.f32 %v142_v29, %v114_v39 }
  0x38   :  { %v160_v51 = vadd.f32 %v159_v42, %v156_v35  ;;  %v163_v52 = vmul.f32 %v162_v36, %v114_v39  ;;  %v180_v53 = vadd.f32 %v179_v45, %v176_v44  ;;  %v183_v54 = vmul.f32 %v182_v46, %v114_v39 }
  0x39   :  { %v125_v55 = vadd.f32 %v124_v48, %v121_v47  ;;  %v144_v56 = vadd.f32 %v143_v50, %v140_v49 }
  0x3a   :  { %v164_v59 = vadd.f32 %v163_v52, %v160_v51  ;;  %v184_v60 = vadd.f32 %v183_v54, %v180_v53 }
  0x3b   :  { %v128_v61 = vadd.f32 %v127_v27, %v125_v55  ;;  %v147_v62 = vadd.f32 %v146_v43, %v144_v56 }
  0x3c   :  { %v167_v63 = vadd.f32 %v166_v57, %v164_v59  ;;  %v187_v0 = vadd.f32 %v186_v58, %v184_v60 }
  0x3d   :  { %v129_v1 = vmul.f32 0.5, %v128_v61  ;;  %v148_v2 = vmul.f32 0.5, %v147_v62 }
  0x3e   :  { %v168_v3 = vmul.f32 0.5, %v167_v63  ;;  %v188_v4 = vmul.f32 0.5, %v187_v0 }
  0x3f   :  { %249 = vtanh.f32 %v129_v1 }
  0x40   :  { %251 = vtanh.f32 %v148_v2 }
  0x41   :  { %253 = vtanh.f32 %v168_v3 }
  0x42   :  { %255 = vtanh.f32 %v188_v4 }
  0x45   :  { %v250_v5 = vpop.eup %249 }
  0x46   :  { %v252_v6 = vpop.eup %251  ;;  %v131_v7 = vmul.f32 0.5, %v250_v5 }
  0x47   :  { %v254_v8 = vpop.eup %253  ;;  %v150_v9 = vmul.f32 0.5, %v252_v6 }
  0x48   :  { %v256_v10 = vpop.eup %255  ;;  %v132_v11 = vadd.f32 0.5, %v131_v7  ;;  %v170_v12 = vmul.f32 0.5, %v254_v8 }
  0x49   :  { %v151_v13 = vadd.f32 0.5, %v150_v9  ;;  %v190_v14 = vmul.f32 0.5, %v256_v10 }
  0x4a   :  { %133 = vst [vmem:[#allocation13] sm:$0xff] %v132_v11  ;;  %v171_v15 = vadd.f32 0.5, %v170_v12 }
  0x4b   :  { %153 = vst [vmem:[#allocation13 + $0x8] sm:$0xff] %v151_v13  ;;  %v191_v16 = vadd.f32 0.5, %v190_v14 }
  0x4c   :  { %173 = vst [vmem:[#allocation13 + $0x10] sm:$0xff] %v171_v15 }
  0x4d   :  { %193 = vst [vmem:[#allocation13 + $0x18] sm:$0xff] %v191_v16 }
  0x4e   :  { %206 = dma.vmem_to_hbm [thread:$0]  %s199_s0, 512, %s201_s8, [#allocation4], %s371_s9, %s371_s9, %s372_s10  }
  0x4f   :  { %363 = dma.done.wait [#allocation4], 512  }
  0x50   :  { %364 = vsyncadd [#allocation4], 4294966784 }
  0x51   :  { %211 = vsyncpa [#allocation3], 1 }
  0x52   :  { %212 = vsyncpa [#allocation4], 1 }
  0x53   :  { %213 = vsyncpa [#allocation5], 1 }
  0x54   :  { %214 = vsyncpa [#allocation8], 1 }
  0x55   :  { %215 = vsyncpa [#allocation6], 1 }
  0x56   :  { %216 = vsyncpa [#allocation11], 1 }

</bundles_post_ra>
